<compile_context>
chip_gen: v5e
topology: v5e:2x2
jax: 0.10.0
libtpu: 0.0.40
codegen_flags: <defaults>
</compile_context>

<pallas_src>
import jax
import jax.numpy as jnp
from jax.experimental import pallas as pl
from jax.experimental.pallas import tpu as pltpu

KSIZE = 5
NCHAN = 4
PAD = KSIZE // 2
C_PAD = 128  # lane-dense padded class axis


def brep_gcn_kernel(conv_ref,                      # SMEM (6,): 5 eff. taps + eff. bias
                    adj_ref, featp_ref,            # VMEM: (N, N) f32, (N, F+4) f32
                    w1_ref, b1_ref,                # VMEM: (F, H) bf16, (1, H) f32
                    w2_ref, b2_ref,                # VMEM: (H, C_PAD) bf16, (1, C_PAD) f32
                    out_ref):                      # VMEM: (N, C_PAD) f32
    F = featp_ref.shape[1] - 2 * PAD
    featp = featp_ref[...]

    # ---- Conv1d(1->4, k=5, pad=2) + channel-sum + ReLU, as 5 shifted MACs ----
    # out[:, i] = b_eff + sum_k w_eff[k] * feat[:, i + k - 2]  (zero padding),
    # i.e. w_eff[k] * featp[:, k : k + F] on the pre-padded feature slab.
    x = conv_ref[KSIZE] + conv_ref[0] * featp[:, 0:F]
    for k in range(1, KSIZE):
        x = x + conv_ref[k] * featp[:, k:k + F]
    x = jnp.maximum(x, 0.0)

    # ---- GCN layer 1: relu(adj @ (x @ W1) + b1) ----
    s1 = jnp.dot(x.astype(jnp.bfloat16), w1_ref[...],
                 preferred_element_type=jnp.float32)
    h = jnp.dot(adj_ref[...], s1, preferred_element_type=jnp.float32) + b1_ref[...]
    h = jnp.maximum(h, 0.0)

    # ---- GCN layer 2: adj @ (h @ W2) + b2 ----
    s2 = jnp.dot(h.astype(jnp.bfloat16), w2_ref[...],
                 preferred_element_type=jnp.float32)
    out_ref[...] = (jnp.dot(adj_ref[...], s2, preferred_element_type=jnp.float32)
                    + b2_ref[...])


def brep_gcn_forward(adjacency, feature, params):
    N, F = feature.shape
    H = params["w1"].shape[1]
    C = params["w2"].shape[1]

    # Effective channel-summed conv taps + bias, packed into one SMEM array.
    w_eff = jnp.sum(params["conv_w"][:, 0, :], axis=0)                  # (5,)
    b_eff = jnp.sum(params["conv_b"])[None]                             # (1,)
    conv_packed = jnp.concatenate([w_eff, b_eff]).astype(jnp.float32)   # (6,)

    feat_pad = jnp.pad(feature, ((0, 0), (PAD, PAD)))                   # (N, F+4)
    w1_bf = params["w1"].astype(jnp.bfloat16)                           # (F, H)
    b1 = params["b1"].reshape(1, H).astype(jnp.float32)
    # Zero-pad the class axis to a lane-dense 128 (sliced off after the call).
    w2_bf = jnp.zeros((H, C_PAD), jnp.bfloat16).at[:, :C].set(
        params["w2"].astype(jnp.bfloat16))
    b2 = jnp.zeros((1, C_PAD), jnp.float32).at[0, :C].set(params["b2"])

    flops = 2 * (N * F * H + N * N * H + N * H * C_PAD + N * N * C_PAD)
    bytes_accessed = (adjacency.size * 4 + feat_pad.size * 4 + w1_bf.size * 2
                      + b1.size * 4 + w2_bf.size * 2 + b2.size * 4 + N * C_PAD * 4)

    out_pad = pl.pallas_call(
        brep_gcn_kernel,
        out_shape=jax.ShapeDtypeStruct((N, C_PAD), jnp.float32),
        in_specs=[
            pl.BlockSpec(memory_space=pltpu.MemorySpace.SMEM),   # conv taps + bias (6,)
            pl.BlockSpec(memory_space=pltpu.MemorySpace.VMEM),   # adjacency (N, N) f32
            pl.BlockSpec(memory_space=pltpu.MemorySpace.VMEM),   # padded feature f32
            pl.BlockSpec(memory_space=pltpu.MemorySpace.VMEM),   # W1 bf16
            pl.BlockSpec(memory_space=pltpu.MemorySpace.VMEM),   # b1 f32
            pl.BlockSpec(memory_space=pltpu.MemorySpace.VMEM),   # W2 bf16 (lane-padded)
            pl.BlockSpec(memory_space=pltpu.MemorySpace.VMEM),   # b2 f32 (lane-padded)
        ],
        out_specs=pl.BlockSpec(memory_space=pltpu.MemorySpace.VMEM),
        cost_estimate=pl.CostEstimate(flops=flops, transcendentals=0,
                                      bytes_accessed=bytes_accessed),
    )(conv_packed, adjacency, feat_pad, w1_bf, b1, w2_bf, b2)
    return out_pad[:, :C]


# ----------------------------- references ---------------------------------- #

def _conv_sum_relu_ref(feature, params):
    x = feature[:, None, :]                                              # (N,1,F)
    conv = jax.lax.conv_general_dilated(
        x, params["conv_w"], window_strides=(1,), padding=((PAD, PAD),),
        dimension_numbers=("NCH", "OIH", "NCH"))
    conv = conv + params["conv_b"][None, :, None]                        # (N,4,F)
    return jnp.maximum(jnp.sum(conv, axis=1), 0.0)                       # (N,F)


def reference_forward(adjacency, feature, params):
    """Pure-JAX f32 reference matching the PyTorch forward exactly."""
    x = _conv_sum_relu_ref(feature, params)
    h = jnp.maximum(adjacency @ (x @ params["w1"]) + params["b1"], 0.0)
    return adjacency @ (h @ params["w2"]) + params["b2"]


def reference_forward_mixed(adjacency, feature, params):
    """Same math, with the same bf16 casts on the x@W1 / h@W2 MXU operands."""
    bf = jnp.bfloat16
    x = _conv_sum_relu_ref(feature, params)
    s1 = jnp.dot(x.astype(bf), params["w1"].astype(bf),
                 preferred_element_type=jnp.float32)
    h = jnp.maximum(adjacency @ s1 + params["b1"], 0.0)
    s2 = jnp.dot(h.astype(bf), params["w2"].astype(bf),
                 preferred_element_type=jnp.float32)
    return adjacency @ s2 + params["b2"]


def init_params(key, input_dim=83, hidden=1024, num_classes=8):
    ks = jax.random.split(key, 5)
    # Conv1d(1, 4, 5): PyTorch default uniform(-1/sqrt(fan_in), +)
    cb = 1.0 / (1 * KSIZE) ** 0.5
    conv_w = jax.random.uniform(ks[0], (NCHAN, 1, KSIZE), jnp.float32, -cb, cb)
    conv_b = jax.random.uniform(ks[1], (NCHAN,), jnp.float32, -cb, cb)
    # GCN weights: kaiming_uniform-style bound, zero bias.
    b1 = (6.0 / input_dim) ** 0.5
    w1 = jax.random.uniform(ks[2], (input_dim, hidden), jnp.float32, -b1, b1)
    b2 = (6.0 / hidden) ** 0.5
    w2 = jax.random.uniform(ks[3], (hidden, num_classes), jnp.float32, -b2, b2)
    return {
        "conv_w": conv_w,
        "conv_b": conv_b,
        "w1": w1,
        "b1": jnp.zeros((hidden,), jnp.float32),
        "w2": w2,
        "b2": jnp.zeros((num_classes,), jnp.float32),
    }


if __name__ == "__main__":
    # TODO(synk): the PyTorch __init__ loads JSON metadata (input_features /
    # segment_names); it does not affect the forward compute and is skipped here.
    N, INPUT_DIM, HIDDEN, NUM_CLASSES = 16, 83, 1024, 8

    key = jax.random.PRNGKey(0)
    k_adj, k_feat, k_par = jax.random.split(key, 3)

    params = init_params(k_par, INPUT_DIM, HIDDEN, NUM_CLASSES)
    # Dense adjacency (stands in for the torch sparse adjacency), lightly scaled.
    adjacency = jax.random.uniform(k_adj, (N, N), jnp.float32) / N
    feature = jax.random.uniform(k_feat, (N, INPUT_DIM), jnp.float32, -1.0, 1.0)

    logits = jax.jit(brep_gcn_forward)(adjacency, feature, params)
    logits = jax.block_until_ready(logits)
    assert logits.shape == (N, NUM_CLASSES)

    # Strict check against a reference that applies the same bf16 MXU-input casts.
    ref_mp = reference_forward_mixed(adjacency, feature, params)
    assert jnp.allclose(logits, ref_mp, rtol=2e-3, atol=2e-3), (
        float(jnp.max(jnp.abs(logits - ref_mp))))
    # Loose check against the exact f32 PyTorch-semantics reference (tolerance
    # accounts for the bf16 weight/activation casts on the matmul path).
    ref = reference_forward(adjacency, feature, params)
    assert jnp.allclose(logits, ref, rtol=1e-2, atol=1e-2), (
        float(jnp.max(jnp.abs(logits - ref))))

    print("KERNEL_OK")
</pallas_src>

<mosaic_0001>
module attributes {stable_mosaic.version = 11 : i64} {
  func.func @brep_gcn_kernel(%arg0: memref<6xf32, #tpu.memory_space<smem>>, %arg1: memref<16x16xf32, #tpu.memory_space<vmem>>, %arg2: memref<16x87xf32, #tpu.memory_space<vmem>>, %arg3: memref<83x1024xbf16, #tpu.memory_space<vmem>>, %arg4: memref<1x1024xf32, #tpu.memory_space<vmem>>, %arg5: memref<1024x128xbf16, #tpu.memory_space<vmem>>, %arg6: memref<1x128xf32, #tpu.memory_space<vmem>>, %arg7: memref<16x128xf32, #tpu.memory_space<vmem>>) attributes {dimension_semantics = [], scalar_prefetch = 0 : i64, scratch_operands = 0 : i64, tpu.core_type = #tpu.core_type<tc>} {
    %c0 = arith.constant 0 : index
    %c0_0 = arith.constant 0 : index
    %0 = vector.load %arg2[%c0, %c0_0] : memref<16x87xf32, #tpu.memory_space<vmem>>, vector<16x87xf32>
    %c5 = arith.constant 5 : index
    %1 = memref.load %arg0[%c5] : memref<6xf32, #tpu.memory_space<smem>>
    %c0_1 = arith.constant 0 : index
    %2 = memref.load %arg0[%c0_1] : memref<6xf32, #tpu.memory_space<smem>>
    %3 = vector.extract_strided_slice %0 {offsets = [0, 0], sizes = [16, 83], strides = [1, 1]} : vector<16x87xf32> to vector<16x83xf32>
    %4 = vector.broadcast %2 : f32 to vector<16x83xf32>
    %5 = arith.mulf %4, %3 : vector<16x83xf32>
    %6 = vector.broadcast %1 : f32 to vector<16x83xf32>
    %7 = arith.addf %6, %5 : vector<16x83xf32>
    %c1 = arith.constant 1 : index
    %8 = memref.load %arg0[%c1] : memref<6xf32, #tpu.memory_space<smem>>
    %9 = vector.extract_strided_slice %0 {offsets = [0, 1], sizes = [16, 83], strides = [1, 1]} : vector<16x87xf32> to vector<16x83xf32>
    %10 = vector.broadcast %8 : f32 to vector<16x83xf32>
    %11 = arith.mulf %10, %9 : vector<16x83xf32>
    %12 = arith.addf %7, %11 : vector<16x83xf32>
    %c2 = arith.constant 2 : index
    %13 = memref.load %arg0[%c2] : memref<6xf32, #tpu.memory_space<smem>>
    %14 = vector.extract_strided_slice %0 {offsets = [0, 2], sizes = [16, 83], strides = [1, 1]} : vector<16x87xf32> to vector<16x83xf32>
    %15 = vector.broadcast %13 : f32 to vector<16x83xf32>
    %16 = arith.mulf %15, %14 : vector<16x83xf32>
    %17 = arith.addf %12, %16 : vector<16x83xf32>
    %c3 = arith.constant 3 : index
    %18 = memref.load %arg0[%c3] : memref<6xf32, #tpu.memory_space<smem>>
    %19 = vector.extract_strided_slice %0 {offsets = [0, 3], sizes = [16, 83], strides = [1, 1]} : vector<16x87xf32> to vector<16x83xf32>
    %20 = vector.broadcast %18 : f32 to vector<16x83xf32>
    %21 = arith.mulf %20, %19 : vector<16x83xf32>
    %22 = arith.addf %17, %21 : vector<16x83xf32>
    %c4 = arith.constant 4 : index
    %23 = memref.load %arg0[%c4] : memref<6xf32, #tpu.memory_space<smem>>
    %24 = vector.extract_strided_slice %0 {offsets = [0, 4], sizes = [16, 83], strides = [1, 1]} : vector<16x87xf32> to vector<16x83xf32>
    %25 = vector.broadcast %23 : f32 to vector<16x83xf32>
    %26 = arith.mulf %25, %24 : vector<16x83xf32>
    %27 = arith.addf %22, %26 : vector<16x83xf32>
    %cst = arith.constant 0.000000e+00 : f32
    %28 = vector.broadcast %cst : f32 to vector<16x83xf32>
    %29 = arith.maximumf %27, %28 : vector<16x83xf32>
    %30 = arith.truncf %29 : vector<16x83xf32> to vector<16x83xbf16>
    %c0_2 = arith.constant 0 : index
    %c0_3 = arith.constant 0 : index
    %31 = vector.load %arg3[%c0_2, %c0_3] : memref<83x1024xbf16, #tpu.memory_space<vmem>>, vector<83x1024xbf16>
    %cst_4 = arith.constant dense<0.000000e+00> : vector<16x1024xf32>
    %32 = tpu.matmul %30, %31, %cst_4 {dimension_numbers = #tpu.dot_dimension_numbers<[1], [0], [0], [1], [0, 0, 1, 1], [], []>} : vector<16x83xbf16>, vector<83x1024xbf16>, vector<16x1024xf32> -> vector<16x1024xf32>
    %c0_5 = arith.constant 0 : index
    %c0_6 = arith.constant 0 : index
    %33 = vector.load %arg1[%c0_5, %c0_6] : memref<16x16xf32, #tpu.memory_space<vmem>>, vector<16x16xf32>
    %cst_7 = arith.constant dense<0.000000e+00> : vector<16x1024xf32>
    %34 = tpu.matmul %33, %32, %cst_7 {dimension_numbers = #tpu.dot_dimension_numbers<[1], [0], [0], [1], [0, 0, 1, 1], [], []>} : vector<16x16xf32>, vector<16x1024xf32>, vector<16x1024xf32> -> vector<16x1024xf32>
    %c0_8 = arith.constant 0 : index
    %c0_9 = arith.constant 0 : index
    %35 = vector.load %arg4[%c0_8, %c0_9] : memref<1x1024xf32, #tpu.memory_space<vmem>>, vector<1x1024xf32>
    %36 = vector.broadcast %35 : vector<1x1024xf32> to vector<16x1024xf32>
    %37 = arith.addf %34, %36 : vector<16x1024xf32>
    %cst_10 = arith.constant 0.000000e+00 : f32
    %38 = vector.broadcast %cst_10 : f32 to vector<16x1024xf32>
    %39 = arith.maximumf %37, %38 : vector<16x1024xf32>
    %40 = arith.truncf %39 : vector<16x1024xf32> to vector<16x1024xbf16>
    %c0_11 = arith.constant 0 : index
    %c0_12 = arith.constant 0 : index
    %41 = vector.load %arg5[%c0_11, %c0_12] : memref<1024x128xbf16, #tpu.memory_space<vmem>>, vector<1024x128xbf16>
    %cst_13 = arith.constant dense<0.000000e+00> : vector<16x128xf32>
    %42 = tpu.matmul %40, %41, %cst_13 {dimension_numbers = #tpu.dot_dimension_numbers<[1], [0], [0], [1], [0, 0, 1, 1], [], []>} : vector<16x1024xbf16>, vector<1024x128xbf16>, vector<16x128xf32> -> vector<16x128xf32>
    %c0_14 = arith.constant 0 : index
    %c0_15 = arith.constant 0 : index
    %43 = vector.load %arg1[%c0_14, %c0_15] : memref<16x16xf32, #tpu.memory_space<vmem>>, vector<16x16xf32>
    %cst_16 = arith.constant dense<0.000000e+00> : vector<16x128xf32>
    %44 = tpu.matmul %43, %42, %cst_16 {dimension_numbers = #tpu.dot_dimension_numbers<[1], [0], [0], [1], [0, 0, 1, 1], [], []>} : vector<16x16xf32>, vector<16x128xf32>, vector<16x128xf32> -> vector<16x128xf32>
    %c0_17 = arith.constant 0 : index
    %c0_18 = arith.constant 0 : index
    %45 = vector.load %arg6[%c0_17, %c0_18] : memref<1x128xf32, #tpu.memory_space<vmem>>, vector<1x128xf32>
    %46 = vector.broadcast %45 : vector<1x128xf32> to vector<16x128xf32>
    %47 = arith.addf %44, %46 : vector<16x128xf32>
    %c0_19 = arith.constant 0 : index
    %c0_20 = arith.constant 0 : index
    %48 = vector.load %arg7[%c0_19, %c0_20] : memref<16x128xf32, #tpu.memory_space<vmem>>, vector<16x128xf32>
    tpu.vector_store %arg7[%c0_19, %c0_20], %47 {strides = array<i32>} : memref<16x128xf32, #tpu.memory_space<vmem>>, vector<16x128xf32>,
    return
  }
}

</mosaic_0001>

<bundles_post_ra>
// kernel: brep_gcn_forward.1
= control target key start
LH: loop header
LB: loop body
LE: loop exit
PB: predicated region body
PF: predicated region fallthrough
CT: control target
= control target key end

     0   :  { %12 = vsyncpa [#allocation3], 0  ;;  %s1984_s27 = smov [#allocation2]   ;;  %s2590_s0 = inlined_call_operand.vmem [shape: f32[6], index: 0, kind: input, shape index: {}]   ;;  %s2591_s1 = inlined_call_operand.vmem [shape: f32[16,16], index: 1, kind: input, shape index: {}]   ;;  %s2592_s2 = inlined_call_operand.vmem [shape: f32[16,87], index: 2, kind: input, shape index: {}]   ;;  %s2593_s3 = inlined_call_operand.vmem [shape: bf16[83,1024], index: 3, kind: input, shape index: {}]   ;;  %s2594_s4 = inlined_call_operand.vmem [shape: f32[1,1024], index: 4, kind: input, shape index: {}]   ;;  %s2595_s5 = inlined_call_operand.vmem [shape: bf16[1024,128], index: 5, kind: input, shape index: {}]   ;;  %s2596_s6 = inlined_call_operand.vmem [shape: f32[1,128], index: 6, kind: input, shape index: {}]   ;;  %s2597_s7 = inlined_call_operand.vmem [shape: f32[16,128], index: 7, kind: output, shape index: {}]  }
   0x1   :  { %s18_s26 = sshll.u32 %s2590_s0, 4  ;;  %s19_s26 = int_to_ptr.vmem [resolvable:$true] %s18_s26 }
   0x2   :  { %21 = dma.vmem_to_smem %s19_s26, 16, %s1984_s27, [#allocation3]  }
   0x3   :  { %1982 = dma.done.wait [#allocation3], 16  }
   0x4   :  { %1983 = vsyncadd [#allocation3], 4294967280 }
   0x5   :  { %38 = sfence }
   0x6   :  { %s2033_s28 = sld [smem:[#allocation2 + $0x2]]  ;;  %vm377_vm0 = vcmask 1040384   ;;  %v149_v0 = vld [vmem:[%s2593_s3 + $0x140] sm:$0x33]  ;;  %vm378_vm1 = vcmask 1041408   ;;  %v1985_v4 = vmov 65535  }
   0x7   :  { %s2035_s29 = sld [smem:[#allocation2 + $0x1]]  ;;  %v277_v1 = vunpack.c.l.b16 %v149_v0  ;;  %v278_v2 = vunpack.c.h.b16 %v149_v0  ;;  %v150_v3 = vld [vmem:[%s2593_s3 + $0x148] sm:$0x33]  ;;  %v379_v5 = vsel %vm377_vm0, 4294967295, %v1985_v4  ;;  %v2048_v8 = vld [vmem:[%s2592_s2] sm:$0xff]  ;;  %s1986_s30 = smov 126  }
   0x8   :  { %s2043_s10 = sld [smem:[#allocation2 + $0x3]]  ;;  %v279_v6 = vunpack.c.l.b16 %v150_v3  ;;  %v280_v7 = vunpack.c.h.b16 %v150_v3  ;;  %v2050_v10 = vsel %vm378_vm1, %v379_v5, 0  ;;  %v1545_v14 = vld [vmem:[%s2593_s3 + $0x100] sm:$0xf]  ;;  %v1889_v16 = vld [vmem:[%s2593_s3 + $0x104] sm:$0xf] }
   0x9   :  { %v325_v9 = vpack.c.b16 %v277_v1, %v277_v1  ;;  %v326_v11 = vpack.c.b16 %v278_v2, %v278_v2  ;;  %v1893_v15 = vld [vmem:[%s2593_s3 + $0x11c] sm:$0xf0]  ;;  %v1547_v20 = vld [vmem:[%s2593_s3 + $0x120] sm:$0xf0]  ;;  %v1553_v21 = vld [vmem:[%s2593_s3 + $0x108] sm:$0xf] }
   0xa   :  { %v327_v12 = vpack.c.b16 %v279_v6, %v279_v6  ;;  %v328_v13 = vpack.c.b16 %v280_v7, %v280_v7  ;;  %v1894_v22 = vld [vmem:[%s2593_s3 + $0x124] sm:$0xf0]  ;;  %v1890_v26 = vld [vmem:[%s2593_s3 + $0x10c] sm:$0xf]  ;;  %v1546_v30 = vor.u32 %v1893_v15, %v1545_v14  ;;  %v1550_v32 = vor.u32 %v1889_v16, %v1547_v20  ;;  %s1987_s9 = smov 127   ;;  %s1414_s0 = sld [smem:[#allocation2 + $0x4]] }
   0xb   :  { %v382_v18 = vand.u32 %v2050_v10, %v325_v9  ;;  %v385_v19 = vand.u32 %v2050_v10, %v326_v11  ;;  %v1555_v27 = vld [vmem:[%s2593_s3 + $0x128] sm:$0xf0]  ;;  %v1554_v33 = vor.u32 %v1894_v22, %v1553_v21  ;;  %s1988_s11 = smov 125   ;;  %v1513_v43 = vld [vmem:[%s2593_s3 + $0xc0] sm:$0xf]  ;;  %s2226_s20 = sld [smem:[#allocation2]] }
   0xc   :  { %v65_v17 = vstv %s2033_s28  ;;  %v388_v25 = vand.u32 %v2050_v10, %v327_v12  ;;  %v391_v29 = vand.u32 %v2050_v10, %v328_v13  ;;  %v2088_v34 = vld [vmem:[%s2592_s2 + $0x8] sm:$0xff]  ;;  %v1558_v36 = vor.u32 %v1890_v26, %v1555_v27  ;;  %s1989_s2 = smov 124   ;;  %v1885_v44 = vld [vmem:[%s2593_s3 + $0xdc] sm:$0xf0]  ;;  %v1881_v45 = vld [vmem:[%s2593_s3 + $0xc4] sm:$0xf] }
   0xd   :  { %v66_v23 = vmul.f32 %v65_v17, %v2048_v8  ;;  %v51_v24 = vstv %s2035_s29  ;;  %407 = vmatpush.bf16.msra.mxu0 %v382_v18  ;;  %421 = vmatpush.bf16.msra.mxu1 %v385_v19  ;;  %v67_v37 = vmul.f32 %v65_v17, %v2088_v34  ;;  %v1514_v46 = vor.u32 %v1885_v44, %v1513_v43  ;;  %v1515_v47 = vld [vmem:[%s2593_s3 + $0xe0] sm:$0xf0]  ;;  %v1521_v48 = vld [vmem:[%s2593_s3 + $0xc8] sm:$0xf]  ;;  %v1882_v52 = vld [vmem:[%s2593_s3 + $0xcc] sm:$0xf] }
   0xe   :  { %v52_v28 = vmul.f32 %v51_v24, %v2048_v8  ;;  %v79_v31 = vstv %s2043_s10  ;;  %435 = vmatpush.bf16.msra.mxu2 %v388_v25  ;;  %449 = vmatpush.bf16.msra.mxu3 %v391_v29  ;;  %v53_v38 = vmul.f32 %v51_v24, %v2088_v34  ;;  %v1886_v49 = vld [vmem:[%s2593_s3 + $0xe4] sm:$0xf0]  ;;  %v1518_v50 = vor.u32 %v1881_v45, %v1515_v47  ;;  %v1523_v53 = vld [vmem:[%s2593_s3 + $0xe8] sm:$0xf0]  ;;  %v1481_v55 = vld [vmem:[%s2593_s3 + $0x80] sm:$0xf] }
   0xf   :  { %70 = vrot.lane.b32.xlu1 %v66_v23, %s1986_s30  ;;  %v80_v35 = vmul.f32 %v79_v31, %v2048_v8  ;;  %v81_v39 = vmul.f32 %v79_v31, %v2088_v34  ;;  %v1522_v51 = vor.u32 %v1886_v49, %v1521_v48  ;;  %v1526_v54 = vor.u32 %v1882_v52, %v1523_v53  ;;  %v1877_v56 = vld [vmem:[%s2593_s3 + $0x9c] sm:$0xf0]  ;;  %v1873_v57 = vld [vmem:[%s2593_s3 + $0x84] sm:$0xf]  ;;  %v1489_v60 = vld [vmem:[%s2593_s3 + $0x88] sm:$0xf] }
  0x10   :  { %56 = vrot.lane.b32.xlu0 %v52_v28, %s1987_s9  ;;  %v93_v40 = vstv %s1414_s0  ;;  %v1482_v58 = vor.u32 %v1877_v56, %v1481_v55  ;;  %v1483_v59 = vld [vmem:[%s2593_s3 + $0xa0] sm:$0xf0]  ;;  %v1878_v61 = vld [vmem:[%s2593_s3 + $0xa4] sm:$0xf0]  ;;  %s2228_s21 = sld [smem:[#allocation2 + $0x5]]  ;;  %vm373_vm2 = vcmask 678912  }
  0x11   :  { %84 = vrot.lane.b32.xlu2 %v80_v35, %s1988_s11  ;;  %408 = vmatpush.bf16.msra.mxu0 %v1546_v30  ;;  %v95_v41 = vmul.f32 %v93_v40, %v2088_v34  ;;  %v94_v42 = vmul.f32 %v93_v40, %v2048_v8  ;;  %v1486_v62 = vor.u32 %v1873_v57, %v1483_v59  ;;  %v1874_v0 = vld [vmem:[%s2593_s3 + $0x8c] sm:$0xf]  ;;  %v1449_v3 = vld [vmem:[%s2593_s3 + $0x40] sm:$0xf]  ;;  %v1865_v5 = vld [vmem:[%s2593_s3 + $0x44] sm:$0xf] }
  0x12   :  { %422 = vmatpush.bf16.msra.mxu1 %v1550_v32  ;;  %436 = vmatpush.bf16.msra.mxu2 %v1554_v33  ;;  %v1490_v63 = vor.u32 %v1878_v61, %v1489_v60  ;;  %v1491_v1 = vld [vmem:[%s2593_s3 + $0xa8] sm:$0xf0]  ;;  %v1869_v4 = vld [vmem:[%s2593_s3 + $0x5c] sm:$0xf0]  ;;  %v1451_v7 = vld [vmem:[%s2593_s3 + $0x60] sm:$0xf0] }
  0x13   :  { %450 = vmatpush.bf16.msra.mxu3 %v1558_v36  ;;  %v1494_v2 = vor.u32 %v1874_v0, %v1491_v1  ;;  %v1450_v6 = vor.u32 %v1869_v4, %v1449_v3  ;;  %v1457_v9 = vld [vmem:[%s2593_s3 + $0x48] sm:$0xf]  ;;  %v1454_v12 = vor.u32 %v1865_v5, %v1451_v7  ;;  %v1866_v14 = vld [vmem:[%s2593_s3 + $0x4c] sm:$0xf]  ;;  %v151_v16 = vld [vmem:[%s2593_s3 + $0x150] sm:$0x33] }
  0x14   :  { %v1870_v11 = vld [vmem:[%s2593_s3 + $0x64] sm:$0xf0]  ;;  %v1459_v15 = vld [vmem:[%s2593_s3 + $0x68] sm:$0xf0]  ;;  %v281_v18 = vunpack.c.l.b16 %v151_v16  ;;  %v282_v19 = vunpack.c.h.b16 %v151_v16  ;;  %v152_v20 = vld [vmem:[%s2593_s3 + $0x158] sm:$0x33] }
  0x15   :  { %409 = vmatpush.bf16.msra.mxu0 %v1514_v46  ;;  %v1458_v13 = vor.u32 %v1870_v11, %v1457_v9  ;;  %v1462_v17 = vor.u32 %v1866_v14, %v1459_v15  ;;  %v1417_v21 = vld [vmem:[%s2593_s3] sm:$0xf]  ;;  %v1857_v23 = vld [vmem:[%s2593_s3 + $0x4] sm:$0xf]  ;;  %v283_v24 = vunpack.c.l.b16 %v152_v20  ;;  %v284_v25 = vunpack.c.h.b16 %v152_v20  ;;  %v1425_v28 = vld [vmem:[%s2593_s3 + $0x8] sm:$0xf] }
  0x16   :  { %423 = vmatpush.bf16.msra.mxu1 %v1518_v50  ;;  %437 = vmatpush.bf16.msra.mxu2 %v1522_v51  ;;  %v1861_v22 = vld [vmem:[%s2593_s3 + $0x1c] sm:$0xf0]  ;;  %v1419_v27 = vld [vmem:[%s2593_s3 + $0x20] sm:$0xf0]  ;;  %v1862_v29 = vld [vmem:[%s2593_s3 + $0x24] sm:$0xf0]  ;;  %v329_v30 = vpack.c.b16 %v281_v18, %v281_v18  ;;  %v330_v31 = vpack.c.b16 %v282_v19, %v282_v19  ;;  %v44_v18 = vstv %s2226_s20 }
  0x17   :  { %72 = vrot.lane.b32.xlu1 %v67_v37, %s1986_s30  ;;  %451 = vmatpush.bf16.msra.mxu3 %v1526_v54  ;;  %v1418_v26 = vor.u32 %v1861_v22, %v1417_v21  ;;  %v1422_v32 = vor.u32 %v1857_v23, %v1419_v27  ;;  %v1426_v33 = vor.u32 %v1862_v29, %v1425_v28  ;;  %v1858_v35 = vld [vmem:[%s2593_s3 + $0xc] sm:$0xf]  ;;  %v1561_v44 = vld [vmem:[%s2593_s3 + $0x110] sm:$0xf]  ;;  %v1891_v46 = vld [vmem:[%s2593_s3 + $0x114] sm:$0xf] }
  0x18   :  { %58 = vrot.lane.b32.xlu0 %v53_v38, %s1987_s9  ;;  %v1427_v36 = vld [vmem:[%s2593_s3 + $0x28] sm:$0xf0]  ;;  %v331_v37 = vpack.c.b16 %v283_v24, %v283_v24  ;;  %v332_v38 = vpack.c.b16 %v284_v25, %v284_v25  ;;  %v394_v40 = vand.u32 %v2050_v10, %v329_v30  ;;  %v1895_v45 = vld [vmem:[%s2593_s3 + $0x12c] sm:$0xf0]  ;;  %v1569_v48 = vld [vmem:[%s2593_s3 + $0x118] sm:$0xf] }
  0x19   :  { %86 = vrot.lane.b32.xlu2 %v81_v39, %s1988_s11  ;;  %410 = vmatpush.bf16.msra.mxu0 %v1482_v58  ;;  %v1430_v39 = vor.u32 %v1858_v35, %v1427_v36  ;;  %v1562_v47 = vor.u32 %v1895_v45, %v1561_v44  ;;  %v1896_v49 = vld [vmem:[%s2593_s3 + $0x134] sm:$0xf0]  ;;  %v1892_v52 = vld [vmem:[%s2593_s3 + $0x11c] sm:$0xf]  ;;  %v1529_v55 = vld [vmem:[%s2593_s3 + $0xd0] sm:$0xf] }
  0x1a   :  { %424 = vmatpush.bf16.msra.mxu1 %v1486_v62  ;;  %438 = vmatpush.bf16.msra.mxu2 %v1490_v63  ;;  %v403_v43 = vand.u32 %v2050_v10, %v332_v38  ;;  %v1570_v51 = vor.u32 %v1896_v49, %v1569_v48  ;;  %v1571_v53 = vld [vmem:[%s2593_s3 + $0x138] sm:$0xf0]  ;;  %v1887_v56 = vld [vmem:[%s2593_s3 + $0xec] sm:$0xf0]  ;;  %v1883_v57 = vld [vmem:[%s2593_s3 + $0xd4] sm:$0xf] }
  0x1b   :  { %452 = vmatpush.bf16.msra.mxu3 %v1494_v2  ;;  %v1574_v54 = vor.u32 %v1892_v52, %v1571_v53  ;;  %v1530_v58 = vor.u32 %v1887_v56, %v1529_v55  ;;  %v1531_v59 = vld [vmem:[%s2593_s3 + $0xf0] sm:$0xf0]  ;;  %v1537_v60 = vld [vmem:[%s2593_s3 + $0xd8] sm:$0xf]  ;;  %v1884_v0 = vld [vmem:[%s2593_s3 + $0xdc] sm:$0xf] }
  0x1c   :  { %v1888_v61 = vld [vmem:[%s2593_s3 + $0xf4] sm:$0xf0]  ;;  %v1534_v62 = vor.u32 %v1883_v57, %v1531_v59  ;;  %v1539_v1 = vld [vmem:[%s2593_s3 + $0xf8] sm:$0xf0]  ;;  %v1497_v2 = vld [vmem:[%s2593_s3 + $0x90] sm:$0xf] }
  0x1d   :  { %411 = vmatpush.bf16.msra.mxu0 %v1450_v6  ;;  %v1538_v63 = vor.u32 %v1888_v61, %v1537_v60  ;;  %v1542_v3 = vor.u32 %v1884_v0, %v1539_v1  ;;  %v1879_v4 = vld [vmem:[%s2593_s3 + $0xac] sm:$0xf0]  ;;  %v1875_v5 = vld [vmem:[%s2593_s3 + $0x94] sm:$0xf]  ;;  %v1505_v11 = vld [vmem:[%s2593_s3 + $0x98] sm:$0xf] }
  0x1e   :  { %425 = vmatpush.bf16.msra.mxu1 %v1454_v12  ;;  %439 = vmatpush.bf16.msra.mxu2 %v1458_v13  ;;  %v1499_v6 = vld [vmem:[%s2593_s3 + $0xb0] sm:$0xf0]  ;;  %v1498_v7 = vor.u32 %v1879_v4, %v1497_v2  ;;  %v1880_v12 = vld [vmem:[%s2593_s3 + $0xb4] sm:$0xf0]  ;;  %v1876_v13 = vld [vmem:[%s2593_s3 + $0x9c] sm:$0xf] }
  0x1f   :  { %100 = vrot.lane.b32.xlu1 %v95_v41, %s1989_s2  ;;  %453 = vmatpush.bf16.msra.mxu3 %v1462_v17  ;;  %v397_v41 = vand.u32 %v2050_v10, %v330_v31  ;;  %v1502_v9 = vor.u32 %v1875_v5, %v1499_v6  ;;  %v1506_v14 = vor.u32 %v1880_v12, %v1505_v11  ;;  %v1507_v15 = vld [vmem:[%s2593_s3 + $0xb8] sm:$0xf0]  ;;  %v1465_v16 = vld [vmem:[%s2593_s3 + $0x50] sm:$0xf]  ;;  %v1867_v20 = vld [vmem:[%s2593_s3 + $0x54] sm:$0xf] }
  0x20   :  { %98 = vrot.lane.b32.xlu0 %v94_v42, %s1989_s2  ;;  %v400_v42 = vand.u32 %v2050_v10, %v331_v37  ;;  %v1563_v10 = vld [vmem:[%s2593_s3 + $0x130] sm:$0xf0]  ;;  %v1871_v17 = vld [vmem:[%s2593_s3 + $0x6c] sm:$0xf0]  ;;  %v1510_v19 = vor.u32 %v1876_v13, %v1507_v15  ;;  %v1473_v22 = vld [vmem:[%s2593_s3 + $0x58] sm:$0xf] }
  0x21   :  { %412 = vmatpush.bf16.msra.mxu0 %v1418_v26  ;;  %v1566_v50 = vor.u32 %v1891_v46, %v1563_v10  ;;  %v1467_v21 = vld [vmem:[%s2593_s3 + $0x70] sm:$0xf0]  ;;  %v1466_v23 = vor.u32 %v1871_v17, %v1465_v16  ;;  %v1872_v24 = vld [vmem:[%s2593_s3 + $0x74] sm:$0xf0]  ;;  %v1868_v25 = vld [vmem:[%s2593_s3 + $0x5c] sm:$0xf] }
  0x22   :  { %426 = vmatpush.bf16.msra.mxu1 %v1422_v32  ;;  %440 = vmatpush.bf16.msra.mxu2 %v1426_v33  ;;  %v1475_v26 = vld [vmem:[%s2593_s3 + $0x78] sm:$0xf0]  ;;  %v1470_v27 = vor.u32 %v1867_v20, %v1467_v21  ;;  %v1474_v28 = vor.u32 %v1872_v24, %v1473_v22  ;;  %v1433_v29 = vld [vmem:[%s2593_s3 + $0x10] sm:$0xf]  ;;  %v1859_v31 = vld [vmem:[%s2593_s3 + $0x14] sm:$0xf]  ;;  %v45_v33 = vmul.f32 %v44_v18, %v2048_v8 }
  0x23   :  { %454 = vmatpush.bf16.msra.mxu3 %v1430_v39  ;;  %v1863_v30 = vld [vmem:[%s2593_s3 + $0x2c] sm:$0xf0]  ;;  %v1478_v35 = vor.u32 %v1868_v25, %v1475_v26  ;;  %v1435_v36 = vld [vmem:[%s2593_s3 + $0x30] sm:$0xf0]  ;;  %v1441_v37 = vld [vmem:[%s2593_s3 + $0x18] sm:$0xf]  ;;  %v47_v39 = vstv %s2228_s21 }
  0x24   :  { %v1864_v38 = vld [vmem:[%s2593_s3 + $0x34] sm:$0xf0]  ;;  %v1860_v8 = vld [vmem:[%s2593_s3 + $0x1c] sm:$0xf]  ;;  %v1434_v44 = vor.u32 %v1863_v30, %v1433_v29  ;;  %v1438_v45 = vor.u32 %v1859_v31, %v1435_v36  ;;  %v2333_v6 = vld [vmem:[%s2591_s1] sm:$0xff]  ;;  %vm537_vm3 = vcmask 130048  }
  0x25   :  { %463 = vmatpush.bf16.msrb.mxu0 %v394_v40  ;;  %v1442_v46 = vor.u32 %v1864_v38, %v1441_v37  ;;  %v1903_v22 = vld [vmem:[%s2595_s5 + $0x30] sm:$0xff]  ;;  %v1920_v24 = vld [vmem:[%s2595_s5 + $0xb8] sm:$0xff]  ;;  %v1902_v26 = vld [vmem:[%s2595_s5 + $0x28] sm:$0xff] }
  0x26   :  { %477 = vmatpush.bf16.msrb.mxu1 %v397_v41  ;;  %491 = vmatpush.bf16.msrb.mxu2 %v400_v42  ;;  %v1443_v41 = vld [vmem:[%s2593_s3 + $0x38] sm:$0xf0]  ;;  %v1927_v29 = vld [vmem:[%s2595_s5 + $0xf0] sm:$0xff]  ;;  %v1901_v30 = vld [vmem:[%s2595_s5 + $0x20] sm:$0xff] }
  0x27   :  { %505 = vmatpush.bf16.msrb.mxu3 %v403_v43  ;;  %v46_v43 = vmul.f32 %v44_v18, %v2088_v34  ;;  %v1446_v10 = vor.u32 %v1860_v8, %v1443_v41  ;;  %v1904_v18 = vld [vmem:[%s2595_s5 + $0x38] sm:$0xff]  ;;  %v1909_v31 = vld [vmem:[%s2595_s5 + $0x60] sm:$0xff] }
  0x28   :  { %v1928_v25 = vld [vmem:[%s2595_s5 + $0xf8] sm:$0xff]  ;;  %v1917_v37 = vld [vmem:[%s2595_s5 + $0xa0] sm:$0xff] }
  0x29   :  { %464 = vmatpush.bf16.msrb.mxu0 %v1562_v47  ;;  %v48_v47 = vadd.f32 %v47_v39, %v45_v33  ;;  %v49_v48 = vadd.f32 %v47_v39, %v46_v43  ;;  %v1926_v33 = vld [vmem:[%s2595_s5 + $0xe8] sm:$0xff]  ;;  %v1908_v36 = vld [vmem:[%s2595_s5 + $0x58] sm:$0xff]  ;;  %v1925_v38 = vld [vmem:[%s2595_s5 + $0xe0] sm:$0xff] }
  0x2a   :  { %478 = vmatpush.bf16.msrb.mxu1 %v1566_v50  ;;  %492 = vmatpush.bf16.msrb.mxu2 %v1570_v51  ;;  %v1899_v39 = vld [vmem:[%s2595_s5 + $0x10] sm:$0xff]  ;;  %v1916_v8 = vld [vmem:[%s2595_s5 + $0x98] sm:$0xff]  ;;  %v1897_v43 = vld [vmem:[%s2595_s5] sm:$0xff] }
  0x2b   :  { %506 = vmatpush.bf16.msrb.mxu3 %v1574_v54  ;;  %v1924_v41 = vld [vmem:[%s2595_s5 + $0xd8] sm:$0xff] }
  0x2d   :  { %465 = vmatpush.bf16.msrb.mxu0 %v1530_v58 }
  0x2e   :  { %479 = vmatpush.bf16.msrb.mxu1 %v1534_v62  ;;  %493 = vmatpush.bf16.msrb.mxu2 %v1538_v63 }
  0x2f   :  { %507 = vmatpush.bf16.msrb.mxu3 %v1542_v3 }
  0x31   :  { %466 = vmatpush.bf16.msrb.mxu0 %v1498_v7  ;;  %v2338_v7 = vld [vmem:[%s2591_s1 + $0x8] sm:$0xff] }
  0x32   :  { %480 = vmatpush.bf16.msrb.mxu1 %v1502_v9  ;;  %494 = vmatpush.bf16.msrb.mxu2 %v1506_v14 }
  0x33   :  { %508 = vmatpush.bf16.msrb.mxu3 %v1510_v19  ;;  %v1912_v19 = vld [vmem:[%s2595_s5 + $0x78] sm:$0xff] }
  0x35   :  { %467 = vmatpush.bf16.msrb.mxu0 %v1466_v23  ;;  %v1911_v23 = vld [vmem:[%s2595_s5 + $0x70] sm:$0xff] }
  0x36   :  { %481 = vmatpush.bf16.msrb.mxu1 %v1470_v27  ;;  %495 = vmatpush.bf16.msrb.mxu2 %v1474_v28  ;;  %v1910_v27 = vld [vmem:[%s2595_s5 + $0x68] sm:$0xff]  ;;  %v1919_v28 = vld [vmem:[%s2595_s5 + $0xb0] sm:$0xff] }
  0x37   :  { %509 = vmatpush.bf16.msrb.mxu3 %v1478_v35  ;;  %v1900_v35 = vld [vmem:[%s2595_s5 + $0x18] sm:$0xff] }
  0x39   :  { %468 = vmatpush.bf16.msrb.mxu0 %v1434_v44  ;;  %v1936_v44 = vld [vmem:[%s2595_s5 + $0x138] sm:$0xff] }
  0x3a   :  { %482 = vmatpush.bf16.msrb.mxu1 %v1438_v45  ;;  %496 = vmatpush.bf16.msrb.mxu2 %v1442_v46  ;;  %v1906_v45 = vld [vmem:[%s2595_s5 + $0x48] sm:$0xff]  ;;  %v1915_v46 = vld [vmem:[%s2595_s5 + $0x90] sm:$0xff] }
  0x3b   :  { %510 = vmatpush.bf16.msrb.mxu3 %v1446_v10  ;;  %v1935_v10 = vld [vmem:[%s2595_s5 + $0x130] sm:$0xff] }
  0x6b   :  { %v85_v42 = vpop.permute.xlu2 %84 }
  0x73   :  { %v87_v34 = vpop.permute.xlu2 %86 }
  0x81   :  { %v71_v32 = vpop.permute.xlu1 %70 }
  0x82   :  { %v57_v40 = vpop.permute.xlu0 %56 }
  0x83   :  { %v62_v49 = vadd.f32 %v57_v40, %v48_v47  ;;  %v1907_v40 = vld [vmem:[%s2595_s5 + $0x50] sm:$0xff] }
  0x84   :  { %v1923_v47 = vld [vmem:[%s2595_s5 + $0xd0] sm:$0xff] }
  0x85   :  { %v76_v53 = vadd.f32 %v71_v32, %v62_v49  ;;  %v1918_v32 = vld [vmem:[%s2595_s5 + $0xa8] sm:$0xff] }
  0x86   :  { %v1914_v49 = vld [vmem:[%s2595_s5 + $0x88] sm:$0xff] }
  0x87   :  { %v90_v56 = vadd.f32 %v85_v42, %v76_v53  ;;  %v1898_v42 = vld [vmem:[%s2595_s5 + $0x8] sm:$0xff]  ;;  %v1913_v53 = vld [vmem:[%s2595_s5 + $0x80] sm:$0xff] }
  0x89   :  { %v73_v50 = vpop.permute.xlu1 %72 }
  0x8a   :  { %v59_v51 = vpop.permute.xlu0 %58 }
  0x8b   :  { %v63_v52 = vadd.f32 %v59_v51, %v49_v48  ;;  %v1905_v48 = vld [vmem:[%s2595_s5 + $0x40] sm:$0xff]  ;;  %v1934_v51 = vld [vmem:[%s2595_s5 + $0x128] sm:$0xff] }
  0x8d   :  { %v77_v54 = vadd.f32 %v73_v50, %v63_v52  ;;  %v1922_v50 = vld [vmem:[%s2595_s5 + $0xc8] sm:$0xff]  ;;  %v1944_v52 = vld [vmem:[%s2595_s5 + $0x178] sm:$0xff] }
  0x8f   :  { %v91_v55 = vadd.f32 %v87_v34, %v77_v54  ;;  %v1921_v34 = vld [vmem:[%s2595_s5 + $0xc0] sm:$0xff] }
  0x90   :  { %v1933_v54 = vld [vmem:[%s2595_s5 + $0x120] sm:$0xff] }
  0x91   :  { %v101_v57 = vpop.permute.xlu1 %100 }
  0x92   :  { %v105_v58 = vadd.f32 %v101_v57, %v91_v55  ;;  %v99_v59 = vpop.permute.xlu0 %98  ;;  %v1943_v55 = vld [vmem:[%s2595_s5 + $0x170] sm:$0xff]  ;;  %v1960_v57 = vld [vmem:[%s2595_s5 + $0x1f8] sm:$0xff] }
  0x93   :  { %v104_v60 = vadd.f32 %v99_v59, %v90_v56  ;;  %v1952_v56 = vld [vmem:[%s2595_s5 + $0x1b8] sm:$0xff]  ;;  %v1942_v59 = vld [vmem:[%s2595_s5 + $0x168] sm:$0xff] }
  0x94   :  { %v107_v61 = vmax.f32 %v105_v58, 0.0  ;;  %v1932_v58 = vld [vmem:[%s2595_s5 + $0x118] sm:$0xff] }
  0x95   :  { %v106_v62 = vmax.f32 %v104_v60, 0.0  ;;  %v1951_v60 = vld [vmem:[%s2595_s5 + $0x1b0] sm:$0xff] }
  0x97   :  { %v108_v63 = vpack.c.bf16 %v107_v61, %v106_v62  ;;  %v1959_v61 = vld [vmem:[%s2595_s5 + $0x1f0] sm:$0xff] }
  0x98   :  { %v1931_v62 = vld [vmem:[%s2595_s5 + $0x110] sm:$0xff] }
  0x99   :  { %1575 = vmatmul.msk.bf16.vlgmr.msra.gmra.mxu0 %vm373_vm2, %v108_v63  ;;  %1576 = vmatmul.msk.bf16.vlgmr.msra.gmra.mxu1 %vm373_vm2, %v108_v63 }
  0x9a   :  { %1577 = vmatmul.msk.bf16.vlgmr.msra.gmra.mxu2 %vm373_vm2, %v108_v63  ;;  %1578 = vmatmul.msk.bf16.vlgmr.msra.gmra.mxu3 %vm373_vm2, %v108_v63 }
  0xa9   :  { %1579 = vmatmul.msk.bf16.vlgmr.msrb.gmra.mxu0 %vm373_vm2, %v108_v63  ;;  %1580 = vmatmul.msk.bf16.vlgmr.msrb.gmra.mxu1 %vm373_vm2, %v108_v63 }
  0xaa   :  { %1581 = vmatmul.msk.bf16.vlgmr.msrb.gmra.mxu2 %vm373_vm2, %v108_v63  ;;  %1582 = vmatmul.msk.bf16.vlgmr.msrb.gmra.mxu3 %vm373_vm2, %v108_v63  ;;  %v1941_v63 = vld [vmem:[%s2595_s5 + $0x160] sm:$0xff] }
 0x116   :  { %v414_v0 = vpop.f32.mrf.mxu0  ;;  %v428_v1 = vpop.f32.mrf.mxu1 }
 0x11d   :  { %v442_v2 = vpop.f32.mrf.mxu2  ;;  %v456_v3 = vpop.f32.mrf.mxu3 }
 0x11e   :  { %v416_v4 = vpop.f32.mrf.mxu0  ;;  %v430_v5 = vpop.f32.mrf.mxu1 }
 0x11f   :  { %558 = vmatpush.msra.mxu0 %v416_v4  ;;  %1961 = vmatpush.msra.mxu1 %v416_v4  ;;  %v1949_v4 = vld [vmem:[%s2595_s5 + $0x1a0] sm:$0xff] }
 0x121   :  { %559 = vmatpush.msra.mxu0 %v414_v0  ;;  %1962 = vmatpush.msra.mxu1 %v414_v0  ;;  %v1950_v0 = vld [vmem:[%s2595_s5 + $0x1a8] sm:$0xff] }
 0x122   :  { %1583 = vmatmul.msk.f32.vlgmr.msra.gmra.mxu0 %vm537_vm3, %v2333_v6  ;;  %1584 = vmatmul.msk.f32.vlgmr.msra.gmra.mxu1 %vm537_vm3, %v2338_v7 }
 0x123   :  { %581 = vmatpush.msrb.mxu1 %v430_v5  ;;  %v1957_v5 = vld [vmem:[%s2595_s5 + $0x1e0] sm:$0xff] }
 0x125   :  { %v444_v9 = vpop.f32.mrf.mxu2  ;;  %v458_v11 = vpop.f32.mrf.mxu3  ;;  %582 = vmatpush.msrb.mxu1 %v428_v1  ;;  %v1958_v1 = vld [vmem:[%s2595_s5 + $0x1e8] sm:$0xff] }
 0x126   :  { %604 = vmatpush.msra.mxu2 %v444_v9  ;;  %627 = vmatpush.msra.mxu3 %v458_v11  ;;  %v470_v12 = vpop.f32.mrf.mxu0  ;;  %v484_v13 = vpop.f32.mrf.mxu1  ;;  %v2531_v9 = vld [vmem:[%s2594_s4] sm:$0xff] }
 0x127   :  { %v1929_v11 = vld [vmem:[%s2595_s5 + $0x100] sm:$0xff] }
 0x128   :  { %605 = vmatpush.msra.mxu2 %v442_v2  ;;  %628 = vmatpush.msra.mxu3 %v456_v3  ;;  %v1930_v2 = vld [vmem:[%s2595_s5 + $0x108] sm:$0xff]  ;;  %v1940_v3 = vld [vmem:[%s2595_s5 + $0x158] sm:$0xff] }
 0x129   :  { %1587 = vmatmul.msk.f32.vlgmr.msra.gmra.mxu2 %vm537_vm3, %v2333_v6  ;;  %1589 = vmatmul.msk.f32.vlgmr.msra.gmra.mxu3 %vm537_vm3, %v2333_v6 }
 0x12a   :  { %1585 = vmatmul.msk.f32.vlgmr.msrb.gmra.mxu1 %vm537_vm3, %v2333_v6 }
 0x12d   :  { %v498_v14 = vpop.f32.mrf.mxu2  ;;  %v512_v15 = vpop.f32.mrf.mxu3 }
 0x12e   :  { %v472_v16 = vpop.f32.mrf.mxu0  ;;  %v486_v17 = vpop.f32.mrf.mxu1 }
 0x12f   :  { %650 = vmatpush.msrb.mxu0 %v472_v16  ;;  %673 = vmatpush.msra.mxu1 %v486_v17  ;;  %v1938_v16 = vld [vmem:[%s2595_s5 + $0x148] sm:$0xff]  ;;  %v1947_v17 = vld [vmem:[%s2595_s5 + $0x190] sm:$0xff] }
 0x131   :  { %1588 = vmatmul.msk.f32.gmra.mxu2 %vm537_vm3, %v2338_v7  ;;  %1590 = vmatmul.msk.f32.gmra.mxu3 %vm537_vm3, %v2338_v7 }
 0x132   :  { %651 = vmatpush.msrb.mxu0 %v470_v12  ;;  %674 = vmatpush.msra.mxu1 %v484_v13  ;;  %v1939_v12 = vld [vmem:[%s2595_s5 + $0x150] sm:$0xff]  ;;  %v1948_v13 = vld [vmem:[%s2595_s5 + $0x198] sm:$0xff] }
 0x133   :  { %1586 = vmatmul.msk.f32.gmra.mxu1 %vm537_vm3, %v2338_v7  ;;  %1591 = vmatmul.msk.f32.vlgmr.msrb.gmra.mxu0 %vm537_vm3, %v2333_v6 }
 0x134   :  { %1264 = vmatpush.bf16.msra.mxu0 %v1904_v18  ;;  %1278 = vmatpush.bf16.msrb.mxu1 %v1912_v19  ;;  %v1955_v18 = vld [vmem:[%s2595_s5 + $0x1d0] sm:$0xff] }
 0x135   :  { %v500_v20 = vpop.f32.mrf.mxu2  ;;  %v514_v21 = vpop.f32.mrf.mxu3 }
 0x136   :  { %696 = vmatpush.msrb.mxu2 %v500_v20  ;;  %719 = vmatpush.msrb.mxu3 %v514_v21 }
 0x138   :  { %697 = vmatpush.msrb.mxu2 %v498_v14  ;;  %720 = vmatpush.msrb.mxu3 %v512_v15  ;;  %v1956_v14 = vld [vmem:[%s2595_s5 + $0x1d8] sm:$0xff]  ;;  %v521_v15 = vperm.slane %v2531_v9, 0 }
 0x139   :  { %1595 = vmatmul.msk.f32.vlgmr.msrb.gmra.mxu2 %vm537_vm3, %v2333_v6  ;;  %1597 = vmatmul.msk.f32.vlgmr.msrb.gmra.mxu3 %vm537_vm3, %v2333_v6 }
 0x13a   :  { %1265 = vmatpush.bf16.msra.mxu0 %v1903_v22  ;;  %1279 = vmatpush.bf16.msrb.mxu1 %v1911_v23 }
 0x13b   :  { %1592 = vmatmul.msk.f32.gmra.mxu0 %vm537_vm3, %v2338_v7  ;;  %1593 = vmatmul.msk.f32.vlgmr.msra.gmra.mxu1 %vm537_vm3, %v2333_v6 }
 0x13c   :  { %1292 = vmatpush.bf16.msra.mxu2 %v1920_v24  ;;  %1306 = vmatpush.bf16.msra.mxu3 %v1928_v25  ;;  %v1937_v25 = vld [vmem:[%s2595_s5 + $0x140] sm:$0xff] }
 0x13e   :  { %1266 = vmatpush.bf16.msra.mxu0 %v1902_v26  ;;  %1280 = vmatpush.bf16.msrb.mxu1 %v1910_v27  ;;  %v1946_v26 = vld [vmem:[%s2595_s5 + $0x188] sm:$0xff] }
 0x13f   :  { %v1954_v27 = vld [vmem:[%s2595_s5 + $0x1c8] sm:$0xff] }
 0x140   :  { %1293 = vmatpush.bf16.msra.mxu2 %v1919_v28  ;;  %1307 = vmatpush.bf16.msra.mxu3 %v1927_v29  ;;  %v1945_v29 = vld [vmem:[%s2595_s5 + $0x180] sm:$0xff] }
 0x141   :  { %1596 = vmatmul.msk.f32.gmra.mxu2 %vm537_vm3, %v2338_v7  ;;  %1598 = vmatmul.msk.f32.gmra.mxu3 %vm537_vm3, %v2338_v7 }
 0x142   :  { %1267 = vmatpush.bf16.msra.mxu0 %v1901_v30  ;;  %1281 = vmatpush.bf16.msrb.mxu1 %v1909_v31  ;;  %v1953_v30 = vld [vmem:[%s2595_s5 + $0x1c0] sm:$0xff] }
 0x143   :  { %1594 = vmatmul.msk.f32.gmra.mxu1 %vm537_vm3, %v2338_v7 }
 0x144   :  { %1294 = vmatpush.bf16.msra.mxu2 %v1918_v32  ;;  %1308 = vmatpush.bf16.msra.mxu3 %v1926_v33  ;;  %v522_v32 = vperm.slane %v2531_v9, 1 }
 0x146   :  { %1268 = vmatpush.bf16.msra.mxu0 %v1900_v35  ;;  %1282 = vmatpush.bf16.msrb.mxu1 %v1908_v36 }
 0x148   :  { %1295 = vmatpush.bf16.msra.mxu2 %v1917_v37  ;;  %1309 = vmatpush.bf16.msra.mxu3 %v1925_v38  ;;  %v523_v37 = vperm.slane %v2531_v9, 2  ;;  %v524_v38 = vperm.slane %v2531_v9, 3 }
 0x14a   :  { %1269 = vmatpush.bf16.msra.mxu0 %v1899_v39  ;;  %1283 = vmatpush.bf16.msrb.mxu1 %v1907_v40 }
 0x14c   :  { %1296 = vmatpush.bf16.msra.mxu2 %v1916_v8  ;;  %1310 = vmatpush.bf16.msra.mxu3 %v1924_v41 }
 0x14e   :  { %1270 = vmatpush.bf16.msra.mxu0 %v1898_v42  ;;  %1284 = vmatpush.bf16.msrb.mxu1 %v1906_v45  ;;  %v525_v42 = vperm.slane %v2531_v9, 4 }
 0x150   :  { %1297 = vmatpush.bf16.msra.mxu2 %v1915_v46  ;;  %1311 = vmatpush.bf16.msra.mxu3 %v1923_v47 }
 0x152   :  { %1271 = vmatpush.bf16.msra.mxu0 %v1897_v43  ;;  %1285 = vmatpush.bf16.msrb.mxu1 %v1905_v48 }
 0x154   :  { %1298 = vmatpush.bf16.msra.mxu2 %v1914_v49  ;;  %1312 = vmatpush.bf16.msra.mxu3 %v1922_v50 }
 0x156   :  { %1320 = vmatpush.bf16.msrb.mxu0 %v1936_v44  ;;  %1334 = vmatpush.bf16.msra.mxu1 %v1944_v52 }
 0x158   :  { %1299 = vmatpush.bf16.msra.mxu2 %v1913_v53  ;;  %1313 = vmatpush.bf16.msra.mxu3 %v1921_v34 }
 0x15a   :  { %1321 = vmatpush.bf16.msrb.mxu0 %v1935_v10  ;;  %1335 = vmatpush.bf16.msra.mxu1 %v1943_v55  ;;  %v526_v55 = vperm.slane %v2531_v9, 5 }
 0x15c   :  { %1348 = vmatpush.bf16.msrb.mxu2 %v1952_v56  ;;  %1362 = vmatpush.bf16.msrb.mxu3 %v1960_v57 }
 0x15e   :  { %1322 = vmatpush.bf16.msrb.mxu0 %v1934_v51  ;;  %1336 = vmatpush.bf16.msra.mxu1 %v1942_v59 }
 0x160   :  { %1349 = vmatpush.bf16.msrb.mxu2 %v1951_v60  ;;  %1363 = vmatpush.bf16.msrb.mxu3 %v1959_v61 }
 0x162   :  { %1323 = vmatpush.bf16.msrb.mxu0 %v1933_v54  ;;  %1337 = vmatpush.bf16.msra.mxu1 %v1941_v63 }
 0x164   :  { %1350 = vmatpush.bf16.msrb.mxu2 %v1950_v0  ;;  %1364 = vmatpush.bf16.msrb.mxu3 %v1958_v1 }
 0x166   :  { %1324 = vmatpush.bf16.msrb.mxu0 %v1932_v58  ;;  %1338 = vmatpush.bf16.msra.mxu1 %v1940_v3  ;;  %v528_v3 = vperm.slane %v2531_v9, 7 }
 0x168   :  { %1351 = vmatpush.bf16.msrb.mxu2 %v1949_v4  ;;  %1365 = vmatpush.bf16.msrb.mxu3 %v1957_v5 }
 0x16a   :  { %1325 = vmatpush.bf16.msrb.mxu0 %v1931_v62  ;;  %1339 = vmatpush.bf16.msra.mxu1 %v1939_v12 }
 0x16c   :  { %1352 = vmatpush.bf16.msrb.mxu2 %v1948_v13  ;;  %1366 = vmatpush.bf16.msrb.mxu3 %v1956_v14 }
 0x16e   :  { %1326 = vmatpush.bf16.msrb.mxu0 %v1930_v2  ;;  %1340 = vmatpush.bf16.msra.mxu1 %v1938_v16  ;;  %v527_v2 = vperm.slane %v2531_v9, 6 }
 0x170   :  { %1353 = vmatpush.bf16.msrb.mxu2 %v1947_v17  ;;  %1367 = vmatpush.bf16.msrb.mxu3 %v1955_v18 }
 0x172   :  { %1327 = vmatpush.bf16.msrb.mxu0 %v1929_v11  ;;  %1341 = vmatpush.bf16.msra.mxu1 %v1937_v25 }
 0x174   :  { %1354 = vmatpush.bf16.msrb.mxu2 %v1946_v26  ;;  %1368 = vmatpush.bf16.msrb.mxu3 %v1954_v27 }
 0x178   :  { %1355 = vmatpush.bf16.msrb.mxu2 %v1945_v29  ;;  %1369 = vmatpush.bf16.msrb.mxu3 %v1953_v30 }
 0x19f   :  { %v561_v19 = vpop.f32.mrf.mxu0  ;;  %v564_v20 = vpop.f32.mrf.mxu1 }
 0x1a0   :  { %v562_v21 = vadd.f32 %v561_v19, %v521_v15  ;;  %v565_v22 = vadd.f32 %v564_v20, %v521_v15 }
 0x1a2   :  { %v728_v23 = vmax.f32 %v562_v21, 0.0  ;;  %v736_v24 = vmax.f32 %v565_v22, 0.0 }
 0x1a4   :  { %v744_v28 = vpack.c.bf16 %v736_v24, %v728_v23 }
 0x1a6   :  { %1272 = vmatmul.bf16.vlgmr.msra.gmra.mxu0 %v744_v28 }
 0x1a7   :  { %v584_v31 = vpop.f32.mrf.mxu1 }
 0x1a8   :  { %v585_v36 = vadd.f32 %v584_v31, %v522_v32 }
 0x1aa   :  { %v729_v8 = vmax.f32 %v585_v36, 0.0 }
 0x1ac   :  { %v607_v33 = vpop.f32.mrf.mxu2  ;;  %v630_v35 = vpop.f32.mrf.mxu3 }
 0x1ad   :  { %v608_v43 = vadd.f32 %v607_v33, %v523_v37  ;;  %v631_v44 = vadd.f32 %v630_v35, %v524_v38 }
 0x1af   :  { %v730_v51 = vmax.f32 %v608_v43, 0.0  ;;  %v731_v52 = vmax.f32 %v631_v44, 0.0 }
 0x1b0   :  { %v587_v39 = vpop.f32.mrf.mxu1  ;;  %v653_v40 = vpop.f32.mrf.mxu0 }
 0x1b1   :  { %v588_v41 = vadd.f32 %v587_v39, %v522_v32  ;;  %v654_v48 = vadd.f32 %v653_v40, %v525_v42 }
 0x1b3   :  { %v737_v45 = vmax.f32 %v588_v41, 0.0  ;;  %v732_v57 = vmax.f32 %v654_v48, 0.0 }
 0x1b4   :  { %v610_v46 = vpop.f32.mrf.mxu2  ;;  %v633_v47 = vpop.f32.mrf.mxu3 }
 0x1b5   :  { %v745_v10 = vpack.c.bf16 %v737_v45, %v729_v8  ;;  %v611_v49 = vadd.f32 %v610_v46, %v523_v37  ;;  %v634_v50 = vadd.f32 %v633_v47, %v524_v38 }
 0x1b7   :  { %v738_v53 = vmax.f32 %v611_v49, 0.0  ;;  %v739_v34 = vmax.f32 %v634_v50, 0.0  ;;  %1286 = vmatmul.bf16.vlgmr.msrb.gmra.mxu1 %v745_v10 }
 0x1b8   :  { %v656_v54 = vpop.f32.mrf.mxu0  ;;  %v676_v56 = vpop.f32.mrf.mxu1 }
 0x1b9   :  { %v746_v58 = vpack.c.bf16 %v738_v53, %v730_v51  ;;  %v747_v59 = vpack.c.bf16 %v739_v34, %v731_v52  ;;  %v657_v60 = vadd.f32 %v656_v54, %v525_v42  ;;  %v677_v1 = vadd.f32 %v676_v56, %v526_v55  ;;  %v1969_v34 = vld [vmem:[%s2596_s6] ss:$0 sm:$0xff] }
 0x1bb   :  { %v740_v61 = vmax.f32 %v657_v60, 0.0  ;;  %1300 = vmatmul.bf16.vlgmr.msra.gmra.mxu2 %v746_v58  ;;  %1314 = vmatmul.bf16.vlgmr.msra.gmra.mxu3 %v747_v59  ;;  %v733_v5 = vmax.f32 %v677_v1, 0.0 }
 0x1bc   :  { %v699_v62 = vpop.f32.mrf.mxu2  ;;  %v722_v63 = vpop.f32.mrf.mxu3 }
 0x1bd   :  { %v748_v0 = vpack.c.bf16 %v740_v61, %v732_v57  ;;  %v700_v12 = vadd.f32 %v699_v62, %v527_v2  ;;  %v723_v13 = vadd.f32 %v722_v63, %v528_v3 }
 0x1bf   :  { %1328 = vmatmul.bf16.vlgmr.msrb.gmra.mxu0 %v748_v0  ;;  %v734_v20 = vmax.f32 %v700_v12, 0.0  ;;  %v735_v21 = vmax.f32 %v723_v13, 0.0 }
 0x1c0   :  { %v679_v4 = vpop.f32.mrf.mxu1 }
 0x1c1   :  { %v680_v11 = vadd.f32 %v679_v4, %v526_v55 }
 0x1c3   :  { %v741_v14 = vmax.f32 %v680_v11, 0.0 }
 0x1c4   :  { %v702_v15 = vpop.f32.mrf.mxu2  ;;  %v725_v16 = vpop.f32.mrf.mxu3 }
 0x1c5   :  { %v749_v17 = vpack.c.bf16 %v741_v14, %v733_v5  ;;  %v703_v18 = vadd.f32 %v702_v15, %v527_v2  ;;  %v726_v19 = vadd.f32 %v725_v16, %v528_v3 }
 0x1c7   :  { %v742_v22 = vmax.f32 %v703_v18, 0.0  ;;  %v743_v23 = vmax.f32 %v726_v19, 0.0  ;;  %1342 = vmatmul.bf16.vlgmr.msra.gmra.mxu1 %v749_v17 }
 0x1c9   :  { %v750_v24 = vpack.c.bf16 %v742_v22, %v734_v20  ;;  %v751_v25 = vpack.c.bf16 %v743_v23, %v735_v21 }
 0x1cb   :  { %1356 = vmatmul.bf16.vlgmr.msrb.gmra.mxu2 %v750_v24  ;;  %1370 = vmatmul.bf16.vlgmr.msrb.gmra.mxu3 %v751_v25 }
 0x223   :  { %v1273_v9 = vpop.f32.mrf.mxu0 }
 0x22b   :  { %v1275_v27 = vpop.f32.mrf.mxu0 }
 0x234   :  { %v1287_v26 = vpop.f32.mrf.mxu1 }
 0x235   :  { %v1288_v35 = vadd.f32 %v1287_v26, %v1273_v9 }
 0x23c   :  { %v1289_v28 = vpop.f32.mrf.mxu1  ;;  %v1329_v31 = vpop.f32.mrf.mxu0 }
 0x23d   :  { %v1290_v36 = vadd.f32 %v1289_v28, %v1275_v27 }
 0x23e   :  { %v1301_v29 = vpop.f32.mrf.mxu2  ;;  %v1315_v30 = vpop.f32.mrf.mxu3 }
 0x23f   :  { %v1302_v38 = vadd.f32 %v1301_v29, %v1288_v35 }
 0x241   :  { %v1316_v40 = vadd.f32 %v1315_v30, %v1302_v38 }
 0x243   :  { %v1330_v44 = vadd.f32 %v1329_v31, %v1316_v40 }
 0x244   :  { %v1343_v37 = vpop.f32.mrf.mxu1  ;;  %v1331_v43 = vpop.f32.mrf.mxu0 }
 0x245   :  { %v1344_v47 = vadd.f32 %v1343_v37, %v1330_v44 }
 0x246   :  { %v1303_v32 = vpop.f32.mrf.mxu2  ;;  %v1317_v33 = vpop.f32.mrf.mxu3 }
 0x247   :  { %v1304_v39 = vadd.f32 %v1303_v32, %v1290_v36 }
 0x249   :  { %v1318_v8 = vadd.f32 %v1317_v33, %v1304_v39 }
 0x24b   :  { %v1332_v45 = vadd.f32 %v1331_v43, %v1318_v8 }
 0x24c   :  { %v1345_v46 = vpop.f32.mrf.mxu1 }
 0x24d   :  { %v1346_v10 = vadd.f32 %v1345_v46, %v1332_v45 }
 0x24e   :  { %v1357_v41 = vpop.f32.mrf.mxu2  ;;  %v1371_v42 = vpop.f32.mrf.mxu3 }
 0x24f   :  { %v1358_v49 = vadd.f32 %v1357_v41, %v1344_v47 }
 0x251   :  { %v1372_v53 = vadd.f32 %v1371_v42, %v1358_v49 }
 0x256   :  { %v1359_v48 = vpop.f32.mrf.mxu2  ;;  %v1373_v51 = vpop.f32.mrf.mxu3 }
 0x257   :  { %v1360_v50 = vadd.f32 %v1359_v48, %v1346_v10 }
 0x259   :  { %v1374_v52 = vadd.f32 %v1373_v51, %v1360_v50 }
 0x25b   :  { %1394 = vmatpush.msra.mxu0 %v1374_v52 }
 0x25d   :  { %1395 = vmatpush.msra.mxu0 %v1372_v53 }
 0x25e   :  { %1855 = vmatmul.msk.f32.vlgmr.msra.gmra.mxu0 %vm537_vm3, %v2333_v6 }
 0x266   :  { %1856 = vmatmul.msk.f32.gmra.mxu0 %vm537_vm3, %v2338_v7 }
 0x2db   :  { %v1397_v54 = vpop.f32.mrf.mxu0 }
 0x2dc   :  { %v1398_v55 = vadd.f32 %v1969_v34, %v1397_v54 }
 0x2de   :  { %1403 = vst [vmem:[%s2597_s7] sm:$0xff] %v1398_v55 }
 0x2e3   :  { %v1400_v56 = vpop.f32.mrf.mxu0 }
 0x2e4   :  { %v1401_v57 = vadd.f32 %v1969_v34, %v1400_v56 }
 0x2e6   :  { %1404 = vst [vmem:[%s2597_s7 + $0x8] sm:$0xff] %v1401_v57 }
 0x2e7   :  { %1409 = vsyncpa [#allocation3], 1 }

</bundles_post_ra>
